<compile_context>
chip_gen: v7x
topology: tpu7x:2x2x1
jax: 0.10.0
libtpu: 0.0.40
codegen_flags: <defaults>
</compile_context>

<pallas_src>
import math
import functools

import jax
import jax.numpy as jnp
from jax import lax
from jax.experimental import pallas as pl
from jax.experimental.pallas import tpu as pltpu

TEMP = 30.0        # RelationUnit.temp
IN_EPS = 1e-5      # InstanceL2Norm.eps
NORM_EPS = 1e-12   # F.normalize(p=2) eps


# --------------------------- fused Pallas kernel -----------------------------

def _decoder_layer_kernel(tgt_ref, mem_ref, pos_ref, wk_ref, bk_ref,
                          o_ref, x1_ref,
                          *, d_model, key_dim, num_imgs, hw, norm_scale):
    """One grid step = one batch element; all tensors VMEM-resident.

    tgt_ref/pos_ref/o_ref/x1_ref: (L, D), mem_ref: (Lm, D)
    wk_ref: (2*D, Dk) = [self_wk ; cross_wk], bk_ref: (2, Dk) = [self_bk ; cross_bk]
    """
    D, Dk = d_model, key_dim
    L = num_imgs * hw

    tgt = tgt_ref[...].astype(jnp.float32)   # (L, D)
    mem = mem_ref[...].astype(jnp.float32)   # (Lm, D)
    pos = pos_ref[...].astype(jnp.float32)   # (L, D)

    # sublane-aligned halves of the stacked weights (free views)
    swk = wk_ref[0:D, :]
    cwk = wk_ref[D:2 * D, :]
    sbk = bk_ref[0:1, :]
    cbk = bk_ref[1:2, :]

    def l2norm_rows(x):
        # F.normalize(p=2): x / max(||x||, eps)  ==  x * rsqrt(max(||x||^2, eps^2))
        ss = jnp.sum(x * x, axis=-1, keepdims=True)
        return x * lax.rsqrt(jnp.maximum(ss, NORM_EPS * NORM_EPS))

    def softmax_rows(logits):
        m = jnp.max(logits, axis=-1, keepdims=True)
        e = jnp.exp(logits - m)
        s = jnp.sum(e, axis=-1, keepdims=True)
        return e * pl.reciprocal(s, approx=True)

    def contract_last(a, b):
        # a @ b.T on the MXU without materializing the transpose
        return lax.dot_general(a, b, (((1,), (1,)), ((), ())),
                               preferred_element_type=jnp.float32)

    inorm_c = norm_scale * math.sqrt(float(D * hw))

    def instance_norm_to(x, dst_ref):
        # Normalize each (hw, D) slab (= one (dim, h, w) instance) and write it
        # straight into dst_ref; slab row ranges are sublane-aligned (hw % 8 == 0).
        for i in range(num_imgs):
            slab = x[i * hw:(i + 1) * hw, :]
            ss = jnp.sum(slab * slab, keepdims=True)            # (1, 1)
            factor = inorm_c * lax.rsqrt(ss + IN_EPS)
            dst_ref[i * hw:(i + 1) * hw, :] = (slab * factor).astype(dst_ref.dtype)

    # ---------------- self-attention (q = k = tgt) + residual + IN #1 ----------------
    wq = l2norm_rows(jnp.dot(tgt, swk, preferred_element_type=jnp.float32) + sbk)   # (L, Dk)
    p = softmax_rows(TEMP * contract_last(wq, wq))                                   # (L, L)
    attn = jnp.dot(p, tgt + pos, preferred_element_type=jnp.float32)                 # (L, D)
    instance_norm_to(tgt + attn, x1_ref)

    x1 = x1_ref[...]                                                                 # (L, D)

    # ---------------- cross-attention (q = tgt', k = memory) + residual + IN #2 ------
    wq2 = l2norm_rows(jnp.dot(x1, cwk, preferred_element_type=jnp.float32) + cbk)    # (L, Dk)
    wk2 = l2norm_rows(jnp.dot(mem, cwk, preferred_element_type=jnp.float32) + cbk)   # (Lm, Dk)
    p2 = softmax_rows(TEMP * contract_last(wq2, wk2))                                # (L, Lm)
    attn2 = jnp.dot(p2, x1 + pos, preferred_element_type=jnp.float32)                # (L, D)
    instance_norm_to(x1 + attn2, o_ref)


# --------------------------- wrapper ------------------------------------------

def transformer_decoder_layer(tgt, memory, input_shape, params, pos=None, query_pos=None):
    """Forward of TransformerDecoderLayer. query_pos accepted but unused (as in reference)."""
    num_imgs, batch, d_model, h, w = input_shape
    L, B, D = tgt.shape
    Lm = memory.shape[0]
    hw = h * w
    assert L == num_imgs * hw and B == batch and D == d_model
    assert Lm == L, "RelationUnit attention requires memory length == value length"

    norm_scale = math.sqrt(1.0 / (d_model * 4 * 4))
    if pos is None:
        pos = jnp.zeros_like(tgt)

    # batch-major layout: tiny XLA transposes outside the kernel so that every
    # per-batch tile inside the kernel is a whole-row, sublane-aligned block.
    tgt2 = jnp.transpose(tgt, (1, 0, 2)).reshape(B * L, D)
    mem2 = jnp.transpose(memory, (1, 0, 2)).reshape(B * Lm, D)
    pos2 = jnp.transpose(pos, (1, 0, 2)).reshape(B * L, D)

    Dk = params["self_wk"].shape[1]
    wk_all = jnp.concatenate([params["self_wk"], params["cross_wk"]], axis=0)   # (2D, Dk)
    bk_all = jnp.concatenate([params["self_bk"], params["cross_bk"]], axis=0)   # (2, Dk)

    kern = functools.partial(
        _decoder_layer_kernel,
        d_model=D, key_dim=Dk, num_imgs=num_imgs, hw=hw, norm_scale=norm_scale)

    out2 = pl.pallas_call(
        kern,
        out_shape=jax.ShapeDtypeStruct((B * L, D), tgt.dtype),
        grid=(B,),
        in_specs=[
            pl.BlockSpec((L, D), lambda b: (b, 0)),
            pl.BlockSpec((Lm, D), lambda b: (b, 0)),
            pl.BlockSpec((L, D), lambda b: (b, 0)),
            pl.BlockSpec((2 * D, Dk), lambda b: (0, 0)),
            pl.BlockSpec((2, Dk), lambda b: (0, 0)),
        ],
        out_specs=pl.BlockSpec((L, D), lambda b: (b, 0)),
        scratch_shapes=[pltpu.VMEM((L, D), jnp.float32)],
        compiler_params=pltpu.CompilerParams(dimension_semantics=("parallel",)),
    )(tgt2, mem2, pos2, wk_all, bk_all)

    return jnp.transpose(out2.reshape(B, L, D), (1, 0, 2))


# --------------------------- pure-JAX reference -------------------------------

def _ref_attention(query, key, value, wk_t, bk):
    def proj(x):
        y = x @ wk_t + bk[0]
        nrm = jnp.maximum(jnp.sqrt(jnp.sum(y * y, -1, keepdims=True)), NORM_EPS)
        return y / nrm
    wq = jnp.transpose(proj(query), (1, 0, 2))          # (B, Lq, Dk)
    wkk = jnp.transpose(proj(key), (1, 2, 0))           # (B, Dk, Lk)
    logits = TEMP * jnp.einsum("bqd,bdk->bqk", wq, wkk)
    p = jax.nn.softmax(logits, axis=-1)
    v = jnp.transpose(value, (1, 0, 2))
    out = jnp.einsum("bqk,bkd->bqd", p, v)
    return jnp.transpose(out, (1, 0, 2))


def _ref_instance_norm(src, input_shape, scale):
    num_imgs, batch, dim, h, w = input_shape
    x = src.reshape(num_imgs, h, w, batch, dim).transpose(0, 3, 4, 1, 2)
    x = x.reshape(-1, dim, h, w)
    ss = jnp.sum((x * x).reshape(x.shape[0], 1, 1, -1), axis=3, keepdims=True)
    x = x * (scale * jnp.sqrt((dim * h * w) / (ss + IN_EPS)))
    x = x.reshape(num_imgs, batch, dim, -1).transpose(0, 3, 1, 2)
    return x.reshape(-1, batch, dim)


def _ref_forward(tgt, memory, input_shape, params, pos=None):
    d_model = tgt.shape[-1]
    scale = math.sqrt(1.0 / (d_model * 4 * 4))
    v1 = tgt if pos is None else tgt + pos
    tgt = tgt + _ref_attention(tgt, tgt, v1, params["self_wk"], params["self_bk"])
    tgt = _ref_instance_norm(tgt, input_shape, scale)
    v2 = tgt if pos is None else tgt + pos
    tgt = tgt + _ref_attention(tgt, memory, v2, params["cross_wk"], params["cross_bk"])
    tgt = _ref_instance_norm(tgt, input_shape, scale)
    return tgt


# --------------------------- main ---------------------------------------------

if __name__ == "__main__":
    num_imgs, batch, d_model, h, w = 2, 2, 32, 4, 4
    key_feature_dim = 64
    L = num_imgs * h * w                  # tgt sequence length
    Lm = L                                # memory length (must match value length here)
    input_shape = (num_imgs, batch, d_model, h, w)

    key = jax.random.PRNGKey(0)
    k1, k2, k3, k4, k5 = jax.random.split(key, 5)

    # RelationUnit init: WK.weight ~ N(0, sqrt(2/out_features)), bias = 0
    std = math.sqrt(2.0 / key_feature_dim)
    self_w = jax.random.normal(k1, (key_feature_dim, d_model), jnp.float32) * std
    cross_w = jax.random.normal(k2, (key_feature_dim, d_model), jnp.float32) * std
    params = {
        "self_wk": self_w.T,                                   # (D, Dk) pre-transposed for x @ W^T
        "self_bk": jnp.zeros((1, key_feature_dim), jnp.float32),
        "cross_wk": cross_w.T,
        "cross_bk": jnp.zeros((1, key_feature_dim), jnp.float32),
    }
    # TODO(synk): RelationUnit.WV and the FFN module are constructed in __init__ but never
    # used in the reference forward pass, so they are intentionally not materialized here.

    tgt = jax.random.normal(k3, (L, batch, d_model), jnp.float32)
    memory = jax.random.normal(k4, (Lm, batch, d_model), jnp.float32)
    pos = jax.random.normal(k5, (L, batch, d_model), jnp.float32)

    out = transformer_decoder_layer(tgt, memory, input_shape, params, pos=pos)
    out = jax.block_until_ready(out)

    ref = jax.block_until_ready(_ref_forward(tgt, memory, input_shape, params, pos=pos))
    assert out.shape == (L, batch, d_model) and out.dtype == jnp.float32
    if not jnp.allclose(out, ref, atol=2e-2, rtol=2e-2):
        raise AssertionError("Pallas kernel output mismatch vs pure-JAX reference")

    print("KERNEL_OK")
</pallas_src>

<mosaic_0001>
module attributes {stable_mosaic.version = 11 : i64} {
  func.func @_decoder_layer_kernel(%arg0: i32, %arg1: memref<32x32xf32, #tpu.memory_space<vmem>>, %arg2: memref<32x32xf32, #tpu.memory_space<vmem>>, %arg3: memref<32x32xf32, #tpu.memory_space<vmem>>, %arg4: memref<64x64xf32, #tpu.memory_space<vmem>>, %arg5: memref<2x64xf32, #tpu.memory_space<vmem>>, %arg6: memref<32x32xf32, #tpu.memory_space<vmem>>, %arg7: memref<32x32xf32, #tpu.memory_space<vmem>>) attributes {dimension_semantics = [#tpu.dimension_semantics<parallel>], iteration_bounds = array<i64: 2>, scalar_prefetch = 0 : i64, scratch_operands = 1 : i64, tpu.core_type = #tpu.core_type<tc>, window_params = [{transform_indices = @transform_0, window_bounds = array<i64: 32, 32>}, {transform_indices = @transform_1, window_bounds = array<i64: 32, 32>}, {transform_indices = @transform_2, window_bounds = array<i64: 32, 32>}, {pipeline_mode = #tpu.pipeline_mode<synchronous>, transform_indices = @transform_3, window_bounds = array<i64: 64, 64>}, {pipeline_mode = #tpu.pipeline_mode<synchronous>, transform_indices = @transform_4, window_bounds = array<i64: 2, 64>}, {transform_indices = @transform_5, window_bounds = array<i64: 32, 32>}]} {
    %c0 = arith.constant 0 : index
    %c0_0 = arith.constant 0 : index
    %0 = vector.load %arg1[%c0, %c0_0] : memref<32x32xf32, #tpu.memory_space<vmem>>, vector<32x32xf32>
    %c0_1 = arith.constant 0 : index
    %c0_2 = arith.constant 0 : index
    %1 = vector.load %arg2[%c0_1, %c0_2] : memref<32x32xf32, #tpu.memory_space<vmem>>, vector<32x32xf32>
    %c0_3 = arith.constant 0 : index
    %c0_4 = arith.constant 0 : index
    %2 = vector.load %arg3[%c0_3, %c0_4] : memref<32x32xf32, #tpu.memory_space<vmem>>, vector<32x32xf32>
    %c0_5 = arith.constant 0 : index
    %c0_6 = arith.constant 0 : index
    %3 = vector.load %arg4[%c0_5, %c0_6] : memref<64x64xf32, #tpu.memory_space<vmem>>, vector<32x64xf32>
    %c32 = arith.constant 32 : index
    %c0_7 = arith.constant 0 : index
    %4 = vector.load %arg4[%c32, %c0_7] : memref<64x64xf32, #tpu.memory_space<vmem>>, vector<32x64xf32>
    %c0_8 = arith.constant 0 : index
    %c0_9 = arith.constant 0 : index
    %5 = vector.load %arg5[%c0_8, %c0_9] : memref<2x64xf32, #tpu.memory_space<vmem>>, vector<1x64xf32>
    %c1 = arith.constant 1 : index
    %c0_10 = arith.constant 0 : index
    %6 = vector.load %arg5[%c1, %c0_10] : memref<2x64xf32, #tpu.memory_space<vmem>>, vector<1x64xf32>
    %cst = arith.constant dense<0.000000e+00> : vector<32x64xf32>
    %7 = tpu.matmul %0, %3, %cst {dimension_numbers = #tpu.dot_dimension_numbers<[1], [0], [0], [1], [0, 0, 1, 1], [], []>} : vector<32x32xf32>, vector<32x64xf32>, vector<32x64xf32> -> vector<32x64xf32>
    %8 = vector.broadcast %5 : vector<1x64xf32> to vector<32x64xf32>
    %9 = arith.addf %7, %8 : vector<32x64xf32>
    %10 = arith.mulf %9, %9 : vector<32x64xf32>
    %cst_11 = arith.constant dense<0.000000e+00> : vector<32xf32>
    %11 = vector.multi_reduction <add>, %10, %cst_11 [1] : vector<32x64xf32> to vector<32xf32>
    %12 = vector.shape_cast %11 : vector<32xf32> to vector<32x1xf32>
    %cst_12 = arith.constant 1.000000e-24 : f32
    %13 = vector.broadcast %cst_12 : f32 to vector<32x1xf32>
    %14 = arith.maximumf %12, %13 : vector<32x1xf32>
    %15 = math.rsqrt %14 : vector<32x1xf32>
    %16 = vector.broadcast %15 : vector<32x1xf32> to vector<32x64xf32>
    %17 = arith.mulf %9, %16 : vector<32x64xf32>
    %cst_13 = arith.constant dense<0.000000e+00> : vector<32x32xf32>
    %18 = tpu.matmul %17, %17, %cst_13 {dimension_numbers = #tpu.dot_dimension_numbers<[1], [1], [0], [0], [0, 0, 1, 0], [], []>} : vector<32x64xf32>, vector<32x64xf32>, vector<32x32xf32> -> vector<32x32xf32>
    %cst_14 = arith.constant 3.000000e+01 : f32
    %19 = vector.broadcast %cst_14 : f32 to vector<32x32xf32>
    %20 = arith.mulf %19, %18 : vector<32x32xf32>
    %cst_15 = arith.constant dense<0xFF800000> : vector<32xf32>
    %21 = vector.multi_reduction <maximumf>, %20, %cst_15 [1] : vector<32x32xf32> to vector<32xf32>
    %22 = vector.shape_cast %21 : vector<32xf32> to vector<32x1xf32>
    %23 = vector.broadcast %22 : vector<32x1xf32> to vector<32x32xf32>
    %24 = arith.subf %20, %23 : vector<32x32xf32>
    %25 = math.exp %24 : vector<32x32xf32>
    %cst_16 = arith.constant dense<0.000000e+00> : vector<32xf32>
    %26 = vector.multi_reduction <add>, %25, %cst_16 [1] : vector<32x32xf32> to vector<32xf32>
    %27 = vector.shape_cast %26 : vector<32xf32> to vector<32x1xf32>
    %28 = tpu.reciprocal %27 {approx = true} : vector<32x1xf32> -> vector<32x1xf32>
    %29 = vector.broadcast %28 : vector<32x1xf32> to vector<32x32xf32>
    %30 = arith.mulf %25, %29 : vector<32x32xf32>
    %31 = arith.addf %0, %2 : vector<32x32xf32>
    %cst_17 = arith.constant dense<0.000000e+00> : vector<32x32xf32>
    %32 = tpu.matmul %30, %31, %cst_17 {dimension_numbers = #tpu.dot_dimension_numbers<[1], [0], [0], [1], [0, 0, 1, 1], [], []>} : vector<32x32xf32>, vector<32x32xf32>, vector<32x32xf32> -> vector<32x32xf32>
    %33 = arith.addf %0, %32 : vector<32x32xf32>
    %34 = vector.extract_strided_slice %33 {offsets = [0, 0], sizes = [16, 32], strides = [1, 1]} : vector<32x32xf32> to vector<16x32xf32>
    %35 = arith.mulf %34, %34 : vector<16x32xf32>
    %36 = vector.shape_cast %35 : vector<16x32xf32> to vector<1x16x32xf32>
    %cst_18 = arith.constant dense<0.000000e+00> : vector<1xf32>
    %37 = vector.multi_reduction <add>, %36, %cst_18 [1, 2] : vector<1x16x32xf32> to vector<1xf32>
    %38 = vector.shape_cast %37 : vector<1xf32> to vector<1x1x1xf32>
    %39 = vector.extract %38[0, 0, 0] : f32 from vector<1x1x1xf32>
    %40 = vector.broadcast %39 : f32 to vector<1x1xf32>
    %cst_19 = arith.constant 9.99999974E-6 : f32
    %41 = vector.broadcast %cst_19 : f32 to vector<1x1xf32>
    %42 = arith.addf %40, %41 : vector<1x1xf32>
    %43 = math.rsqrt %42 : vector<1x1xf32>
    %cst_20 = arith.constant 1.000000e+00 : f32
    %44 = vector.broadcast %cst_20 : f32 to vector<1x1xf32>
    %45 = arith.mulf %44, %43 : vector<1x1xf32>
    %46 = vector.broadcast %45 : vector<1x1xf32> to vector<16x32xf32>
    %47 = arith.mulf %34, %46 : vector<16x32xf32>
    %c0_21 = arith.constant 0 : index
    %c0_22 = arith.constant 0 : index
    %48 = vector.load %arg7[%c0_21, %c0_22] : memref<32x32xf32, #tpu.memory_space<vmem>>, vector<16x32xf32>
    tpu.vector_store %arg7[%c0_21, %c0_22], %47 {strides = array<i32>} : memref<32x32xf32, #tpu.memory_space<vmem>>, vector<16x32xf32>,
    %49 = vector.extract_strided_slice %33 {offsets = [16, 0], sizes = [16, 32], strides = [1, 1]} : vector<32x32xf32> to vector<16x32xf32>
    %50 = arith.mulf %49, %49 : vector<16x32xf32>
    %51 = vector.shape_cast %50 : vector<16x32xf32> to vector<1x16x32xf32>
    %cst_23 = arith.constant dense<0.000000e+00> : vector<1xf32>
    %52 = vector.multi_reduction <add>, %51, %cst_23 [1, 2] : vector<1x16x32xf32> to vector<1xf32>
    %53 = vector.shape_cast %52 : vector<1xf32> to vector<1x1x1xf32>
    %54 = vector.extract %53[0, 0, 0] : f32 from vector<1x1x1xf32>
    %55 = vector.broadcast %54 : f32 to vector<1x1xf32>
    %cst_24 = arith.constant 9.99999974E-6 : f32
    %56 = vector.broadcast %cst_24 : f32 to vector<1x1xf32>
    %57 = arith.addf %55, %56 : vector<1x1xf32>
    %58 = math.rsqrt %57 : vector<1x1xf32>
    %cst_25 = arith.constant 1.000000e+00 : f32
    %59 = vector.broadcast %cst_25 : f32 to vector<1x1xf32>
    %60 = arith.mulf %59, %58 : vector<1x1xf32>
    %61 = vector.broadcast %60 : vector<1x1xf32> to vector<16x32xf32>
    %62 = arith.mulf %49, %61 : vector<16x32xf32>
    %c16 = arith.constant 16 : index
    %c0_26 = arith.constant 0 : index
    %63 = vector.load %arg7[%c16, %c0_26] : memref<32x32xf32, #tpu.memory_space<vmem>>, vector<16x32xf32>
    tpu.vector_store %arg7[%c16, %c0_26], %62 {strides = array<i32>} : memref<32x32xf32, #tpu.memory_space<vmem>>, vector<16x32xf32>,
    %c0_27 = arith.constant 0 : index
    %c0_28 = arith.constant 0 : index
    %64 = vector.load %arg7[%c0_27, %c0_28] : memref<32x32xf32, #tpu.memory_space<vmem>>, vector<32x32xf32>
    %cst_29 = arith.constant dense<0.000000e+00> : vector<32x64xf32>
    %65 = tpu.matmul %64, %4, %cst_29 {dimension_numbers = #tpu.dot_dimension_numbers<[1], [0], [0], [1], [0, 0, 1, 1], [], []>} : vector<32x32xf32>, vector<32x64xf32>, vector<32x64xf32> -> vector<32x64xf32>
    %66 = vector.broadcast %6 : vector<1x64xf32> to vector<32x64xf32>
    %67 = arith.addf %65, %66 : vector<32x64xf32>
    %68 = arith.mulf %67, %67 : vector<32x64xf32>
    %cst_30 = arith.constant dense<0.000000e+00> : vector<32xf32>
    %69 = vector.multi_reduction <add>, %68, %cst_30 [1] : vector<32x64xf32> to vector<32xf32>
    %70 = vector.shape_cast %69 : vector<32xf32> to vector<32x1xf32>
    %cst_31 = arith.constant 1.000000e-24 : f32
    %71 = vector.broadcast %cst_31 : f32 to vector<32x1xf32>
    %72 = arith.maximumf %70, %71 : vector<32x1xf32>
    %73 = math.rsqrt %72 : vector<32x1xf32>
    %74 = vector.broadcast %73 : vector<32x1xf32> to vector<32x64xf32>
    %75 = arith.mulf %67, %74 : vector<32x64xf32>
    %cst_32 = arith.constant dense<0.000000e+00> : vector<32x64xf32>
    %76 = tpu.matmul %1, %4, %cst_32 {dimension_numbers = #tpu.dot_dimension_numbers<[1], [0], [0], [1], [0, 0, 1, 1], [], []>} : vector<32x32xf32>, vector<32x64xf32>, vector<32x64xf32> -> vector<32x64xf32>
    %77 = vector.broadcast %6 : vector<1x64xf32> to vector<32x64xf32>
    %78 = arith.addf %76, %77 : vector<32x64xf32>
    %79 = arith.mulf %78, %78 : vector<32x64xf32>
    %cst_33 = arith.constant dense<0.000000e+00> : vector<32xf32>
    %80 = vector.multi_reduction <add>, %79, %cst_33 [1] : vector<32x64xf32> to vector<32xf32>
    %81 = vector.shape_cast %80 : vector<32xf32> to vector<32x1xf32>
    %cst_34 = arith.constant 1.000000e-24 : f32
    %82 = vector.broadcast %cst_34 : f32 to vector<32x1xf32>
    %83 = arith.maximumf %81, %82 : vector<32x1xf32>
    %84 = math.rsqrt %83 : vector<32x1xf32>
    %85 = vector.broadcast %84 : vector<32x1xf32> to vector<32x64xf32>
    %86 = arith.mulf %78, %85 : vector<32x64xf32>
    %cst_35 = arith.constant dense<0.000000e+00> : vector<32x32xf32>
    %87 = tpu.matmul %75, %86, %cst_35 {dimension_numbers = #tpu.dot_dimension_numbers<[1], [1], [0], [0], [0, 0, 1, 0], [], []>} : vector<32x64xf32>, vector<32x64xf32>, vector<32x32xf32> -> vector<32x32xf32>
    %cst_36 = arith.constant 3.000000e+01 : f32
    %88 = vector.broadcast %cst_36 : f32 to vector<32x32xf32>
    %89 = arith.mulf %88, %87 : vector<32x32xf32>
    %cst_37 = arith.constant dense<0xFF800000> : vector<32xf32>
    %90 = vector.multi_reduction <maximumf>, %89, %cst_37 [1] : vector<32x32xf32> to vector<32xf32>
    %91 = vector.shape_cast %90 : vector<32xf32> to vector<32x1xf32>
    %92 = vector.broadcast %91 : vector<32x1xf32> to vector<32x32xf32>
    %93 = arith.subf %89, %92 : vector<32x32xf32>
    %94 = math.exp %93 : vector<32x32xf32>
    %cst_38 = arith.constant dense<0.000000e+00> : vector<32xf32>
    %95 = vector.multi_reduction <add>, %94, %cst_38 [1] : vector<32x32xf32> to vector<32xf32>
    %96 = vector.shape_cast %95 : vector<32xf32> to vector<32x1xf32>
    %97 = tpu.reciprocal %96 {approx = true} : vector<32x1xf32> -> vector<32x1xf32>
    %98 = vector.broadcast %97 : vector<32x1xf32> to vector<32x32xf32>
    %99 = arith.mulf %94, %98 : vector<32x32xf32>
    %100 = arith.addf %64, %2 : vector<32x32xf32>
    %cst_39 = arith.constant dense<0.000000e+00> : vector<32x32xf32>
    %101 = tpu.matmul %99, %100, %cst_39 {dimension_numbers = #tpu.dot_dimension_numbers<[1], [0], [0], [1], [0, 0, 1, 1], [], []>} : vector<32x32xf32>, vector<32x32xf32>, vector<32x32xf32> -> vector<32x32xf32>
    %102 = arith.addf %64, %101 : vector<32x32xf32>
    %103 = vector.extract_strided_slice %102 {offsets = [0, 0], sizes = [16, 32], strides = [1, 1]} : vector<32x32xf32> to vector<16x32xf32>
    %104 = arith.mulf %103, %103 : vector<16x32xf32>
    %105 = vector.shape_cast %104 : vector<16x32xf32> to vector<1x16x32xf32>
    %cst_40 = arith.constant dense<0.000000e+00> : vector<1xf32>
    %106 = vector.multi_reduction <add>, %105, %cst_40 [1, 2] : vector<1x16x32xf32> to vector<1xf32>
    %107 = vector.shape_cast %106 : vector<1xf32> to vector<1x1x1xf32>
    %108 = vector.extract %107[0, 0, 0] : f32 from vector<1x1x1xf32>
    %109 = vector.broadcast %108 : f32 to vector<1x1xf32>
    %cst_41 = arith.constant 9.99999974E-6 : f32
    %110 = vector.broadcast %cst_41 : f32 to vector<1x1xf32>
    %111 = arith.addf %109, %110 : vector<1x1xf32>
    %112 = math.rsqrt %111 : vector<1x1xf32>
    %cst_42 = arith.constant 1.000000e+00 : f32
    %113 = vector.broadcast %cst_42 : f32 to vector<1x1xf32>
    %114 = arith.mulf %113, %112 : vector<1x1xf32>
    %115 = vector.broadcast %114 : vector<1x1xf32> to vector<16x32xf32>
    %116 = arith.mulf %103, %115 : vector<16x32xf32>
    %c0_43 = arith.constant 0 : index
    %c0_44 = arith.constant 0 : index
    %117 = vector.load %arg6[%c0_43, %c0_44] : memref<32x32xf32, #tpu.memory_space<vmem>>, vector<16x32xf32>
    tpu.vector_store %arg6[%c0_43, %c0_44], %116 {strides = array<i32>} : memref<32x32xf32, #tpu.memory_space<vmem>>, vector<16x32xf32>,
    %118 = vector.extract_strided_slice %102 {offsets = [16, 0], sizes = [16, 32], strides = [1, 1]} : vector<32x32xf32> to vector<16x32xf32>
    %119 = arith.mulf %118, %118 : vector<16x32xf32>
    %120 = vector.shape_cast %119 : vector<16x32xf32> to vector<1x16x32xf32>
    %cst_45 = arith.constant dense<0.000000e+00> : vector<1xf32>
    %121 = vector.multi_reduction <add>, %120, %cst_45 [1, 2] : vector<1x16x32xf32> to vector<1xf32>
    %122 = vector.shape_cast %121 : vector<1xf32> to vector<1x1x1xf32>
    %123 = vector.extract %122[0, 0, 0] : f32 from vector<1x1x1xf32>
    %124 = vector.broadcast %123 : f32 to vector<1x1xf32>
    %cst_46 = arith.constant 9.99999974E-6 : f32
    %125 = vector.broadcast %cst_46 : f32 to vector<1x1xf32>
    %126 = arith.addf %124, %125 : vector<1x1xf32>
    %127 = math.rsqrt %126 : vector<1x1xf32>
    %cst_47 = arith.constant 1.000000e+00 : f32
    %128 = vector.broadcast %cst_47 : f32 to vector<1x1xf32>
    %129 = arith.mulf %128, %127 : vector<1x1xf32>
    %130 = vector.broadcast %129 : vector<1x1xf32> to vector<16x32xf32>
    %131 = arith.mulf %118, %130 : vector<16x32xf32>
    %c16_48 = arith.constant 16 : index
    %c0_49 = arith.constant 0 : index
    %132 = vector.load %arg6[%c16_48, %c0_49] : memref<32x32xf32, #tpu.memory_space<vmem>>, vector<16x32xf32>
    tpu.vector_store %arg6[%c16_48, %c0_49], %131 {strides = array<i32>} : memref<32x32xf32, #tpu.memory_space<vmem>>, vector<16x32xf32>,
    return
  }
  func.func @transform_0(%arg0: i32) -> (i32, i32) {
    %c0_i32 = arith.constant 0 : i32
    %c0_i32_0 = arith.constant 0 : i32
    return %arg0, %c0_i32 : i32, i32
  }
  func.func @transform_1(%arg0: i32) -> (i32, i32) {
    %c0_i32 = arith.constant 0 : i32
    %c0_i32_0 = arith.constant 0 : i32
    return %arg0, %c0_i32 : i32, i32
  }
  func.func @transform_2(%arg0: i32) -> (i32, i32) {
    %c0_i32 = arith.constant 0 : i32
    %c0_i32_0 = arith.constant 0 : i32
    return %arg0, %c0_i32 : i32, i32
  }
  func.func @transform_3(%arg0: i32) -> (i32, i32) {
    %c0_i32 = arith.constant 0 : i32
    %c0_i32_0 = arith.constant 0 : i32
    %c0_i32_1 = arith.constant 0 : i32
    return %c0_i32, %c0_i32_0 : i32, i32
  }
  func.func @transform_4(%arg0: i32) -> (i32, i32) {
    %c0_i32 = arith.constant 0 : i32
    %c0_i32_0 = arith.constant 0 : i32
    %c0_i32_1 = arith.constant 0 : i32
    return %c0_i32, %c0_i32_0 : i32, i32
  }
  func.func @transform_5(%arg0: i32) -> (i32, i32) {
    %c0_i32 = arith.constant 0 : i32
    %c0_i32_0 = arith.constant 0 : i32
    return %arg0, %c0_i32 : i32, i32
  }
}

</mosaic_0001>

<bundles_post_ra>
// kernel: tpu_custom_call.1
= control target key start
LH: loop header
LB: loop body
LE: loop exit
PB: predicated region body
PF: predicated region fallthrough
CT: control target
= control target key end

     0   :  { %s1748_s18 = smov 0   ;;  %s2002_s0 = inlined_call_operand.vmem [shape: f32[64,32], index: 0, kind: input, shape index: {}]   ;;  %s2003_s1 = inlined_call_operand.vmem [shape: f32[64,32], index: 1, kind: input, shape index: {}]   ;;  %s2004_s2 = inlined_call_operand.vmem [shape: f32[64,32], index: 2, kind: input, shape index: {}]   ;;  %s2005_s3 = inlined_call_operand.vmem [shape: f32[64,64], index: 3, kind: input, shape index: {}]   ;;  %s2006_s4 = inlined_call_operand.vmem [shape: f32[2,64], index: 4, kind: input, shape index: {}]   ;;  %s2007_s5 = inlined_call_operand.vmem [shape: f32[64,32], index: 5, kind: output, shape index: {}]  }
   0x1 LB: > { %s1359_s19 = sadd.s32 4294967295, %s1716_s18   ;;  %p1363_p0 = scmp.ge.s32.totalorder %s1716_s18, 1  ;;  %s1716_s18 = sphi %s1748_s18, %s15_s18  }
   0x2   : > { %p210_p1 = scmp.lt.s32.totalorder %s1716_s18, 3 }
   0x4   : > { %p211_p2 = pnand %p1363_p0, %p210_p1 }
   0x5   : > { %v284_v0 = vld [vmem:[%s2005_s3] sm:$0xff] (!%p211_p2)  ;;  %v285_v1 = vld [vmem:[%s2005_s3 + $0x8] sm:$0xff] (!%p211_p2)  ;;  %v286_v2 = vld [vmem:[%s2005_s3 + $0x10] sm:$0xff] (!%p211_p2)  ;;  %s1364_s26 = sshll.u32 (!%p211_p2), %s1359_s19, 2  ;;  %vm298_vm0 = vcmask (!%p211_p2), 261120   ;;  %vm400_vm1 = vcmask (!%p211_p2), 523264  }
   0x6   : > { %214 = sbr.rel (%p211_p2) target bundleno = 2745 (0xab9), region = 40  ;;  %v1566_v3 = vpack.c.bf16 (!%p211_p2), %v285_v1, %v284_v0  ;;  %v287_v4 = vld [vmem:[%s2005_s3 + $0x18] sm:$0xff] (!%p211_p2)  ;;  %p249_p3 = scmp.lt.s32.totalorder (!%p211_p2), %s1364_s26, 7  ;;  %v1372_v10 = vld [vmem:[%s2006_s4] ss:$0 sm:$0xff] (!%p211_p2)  ;;  %vm1800_vm2 = vmpackc.low (!%p211_p2), %vm400_vm1, %vm400_vm1 }
   0x7   : > { %v1570_v5 = vpack.c.bf16 (!%p211_p2), %v287_v4, %v286_v2 }
   0x8   : > { %1567 = vmatprep.subr.bf16.mxu0 (!%p211_p2), %v1566_v3 }
   0x9   : > { %1569 = vmatpush3.bf16.msra.mxu0 (!%p211_p2), %v1566_v3 }
   0xa   : > { %1571 = vmatprep.subr.bf16.mxu0 (!%p211_p2), %v1570_v5 }
   0xd   : > { %s2011_s26 = smov (!%p249_p3, %s1364_s26), 7  ;;  %1573 = vmatpush3.bf16.msra.mxu0 %v1570_v5 }
   0xe   : > { %s1768_s29 = sshll.u32 %s2011_s26, 3 }
   0xf   : > { %s252_s7 = scalar_lea.vmem %s2002_s0, %s1768_s29  ;;  %s264_s12 = scalar_lea.vmem %s2004_s2, %s1768_s29 }
  0x10   : > { %v1774_v6 = vld [vmem:[%s252_s7] sm:$0xff]  ;;  %v1778_v7 = vld [vmem:[%s252_s7 + $0x8] sm:$0xff]  ;;  %v1780_v8 = vld [vmem:[%s252_s7 + $0x10] sm:$0xff]  ;;  %s258_s22 = scalar_lea.vmem %s2003_s1, %s1768_s29  ;;  %s270_s9 = scalar_lea.vmem %s2007_s5, %s1768_s29 }
  0x11   : > { %1476 = vmatprep.mubr.msk.f32.mxu0 %vm298_vm0, %v1774_v6  ;;  %v1786_v9 = vld [vmem:[%s252_s7 + $0x18] sm:$0xff] }
  0x12   : > { %1477 = vmatmul.mubr.msk.f32.vlgmr.msra.gmra.mrb[0].mxu0 %vm298_vm0, %v1778_v7 }
  0x13   : > { %1479 = vmatprep.mubr.msk.f32.mxu0 %vm298_vm0, %v1780_v8 }
  0x16   : > { %1480 = vmatmul.mubr.msk.f32.gmra.mrb[2].mxu0 %vm298_vm0, %v1786_v9 }
  0xe5   : > { %v1478_v11 = vpop.f32.mrb[0].mxu0 }
  0xe6   : > { %v377_v12 = vpop.f32.mrb[1].mxu0  ;;  %v383_v13 = vadd.f32 %v1478_v11, %v1372_v10 }
  0xe7   : > { %v378_v14 = vadd.f32 %v1372_v10, %v377_v12 }
  0xe8   : > { %v397_v21 = vmul.f32 %v383_v13, %v383_v13 }
  0xe9   : > { %v1481_v15 = vpop.f32.mrb[2].mxu0  ;;  %v396_v16 = vmul.f32 %v378_v14, %v378_v14 }
  0xea   : > { %v393_v17 = vadd.f32 %v1481_v15, %v1372_v10  ;;  %v387_v18 = vpop.f32.mrb[3].mxu0  ;;  %v404_v25 = vsel %vm400_vm1, %v397_v21, 0.0 }
  0xeb   : > { %v388_v19 = vadd.f32 %v1372_v10, %v387_v18  ;;  %v401_v20 = vsel %vm400_vm1, %v396_v16, 0.0  ;;  %v1827_v18 = vld [vmem:[%s264_s12] sm:$0xff] }
  0xec   : > { %402 = vadd.xlane.f32.xlu0 %v401_v20  ;;  %v399_v23 = vmul.f32 %v393_v17, %v393_v17  ;;  %v570_v20 = vadd.f32 %v1827_v18, %v1774_v6 }
  0xed   : > { %v398_v22 = vmul.f32 %v388_v19, %v388_v19 }
  0xee   : > { %v410_v26 = vsel %vm400_vm1, %v399_v23, 0.0  ;;  %v1837_v23 = vld [vmem:[%s264_s12 + $0x18] sm:$0xff] }
  0xef   : > { %v407_v24 = vsel %vm400_vm1, %v398_v22, 0.0  ;;  %v1835_v22 = vld [vmem:[%s264_s12 + $0x10] sm:$0xff] }
  0xf0   : > { %408 = vadd.xlane.f32.xlu1 %v407_v24  ;;  %405 = vadd.xlane.f32.xlu0 %v404_v25  ;;  %v572_v24 = vadd.f32 %v1835_v22, %v1780_v8  ;;  %v573_v25 = vadd.f32 %v1837_v23, %v1786_v9 }
  0xf4   : > { %411 = vadd.xlane.f32.xlu1 %v410_v26 }
 0x179   : > { %v403_v27 = vpop.xlane.xlu0 %402 }
 0x17a   : > { %v413_v28 = vmax.f32 %v403_v27, 1e-24  ;;  %v1590_v27 = vpack.c.bf16 %v573_v25, %v572_v24 }
 0x17c   : > { %1646 = vrsqrt.f32 %v413_v28 }
 0x17d   : > { %v409_v29 = vpop.xlane.xlu1 %408  ;;  %v406_v30 = vpop.xlane.xlu0 %405 }
 0x17e   : > { %v415_v31 = vmax.f32 %v409_v29, 1e-24  ;;  %v414_v32 = vmax.f32 %v406_v30, 1e-24 }
 0x180   : > { %1648 = vrsqrt.f32 %v414_v32 }
 0x181   : > { %v412_v33 = vpop.xlane.xlu1 %411  ;;  %1650 = vrsqrt.f32 %v415_v31 }
 0x182   : > { %v416_v34 = vmax.f32 %v412_v33, 1e-24 }
 0x184   : > { %1652 = vrsqrt.f32 %v416_v34 }
 0x186   : > { %v1647_v35 = vpop.eup %1646 }
 0x187   : > { %v421_v36 = vmul.f32 %v1647_v35, %v378_v14 }
 0x189   : > { %1490 = vmatprep.mubr.msk.f32.mxu1 %vm400_vm1, %v421_v36 }
 0x18a   : > { %v1649_v37 = vpop.eup %1648 }
 0x18b   : > { %v1651_v38 = vpop.eup %1650  ;;  %v422_v39 = vmul.f32 %v1649_v37, %v383_v13 }
 0x18c   : > { %v423_v43 = vmul.f32 %v1651_v38, %v388_v19  ;;  %v1829_v19 = vld [vmem:[%s264_s12 + $0x8] sm:$0xff] }
 0x18d   : > { %v1574_v42 = vpack.c.bf16 %v422_v39, %v421_v36  ;;  %v571_v21 = vadd.f32 %v1829_v19, %v1778_v7 }
 0x18e   : > { %v1653_v41 = vpop.eup %1652 }
 0x18f   : > { %v424_v44 = vmul.f32 %v1653_v41, %v393_v17  ;;  %1576 = vmatprep.subr.msk.bf16.mxu1 %vm1800_vm2, %v1574_v42  ;;  %v1586_v26 = vpack.c.bf16 %v571_v21, %v570_v20  ;;  %v288_v41 = vld [vmem:[%s2005_s3 + $0x20] sm:$0xff] }
 0x190   : > { %1579 = vmatpush3.bf16.xpose.msk.msra.mxu1 %vm1800_vm2, %v1574_v42  ;;  %v289_v42 = vld [vmem:[%s2005_s3 + $0x28] sm:$0xff] }
 0x191   : > { %v1580_v45 = vpack.c.bf16 %v424_v44, %v423_v43  ;;  %1587 = vmatprep.subr.bf16.mxu0 %v1586_v26 }
 0x192   : > { %1589 = vmatpush3.bf16.msra.mxu0 %v1586_v26 }
 0x193   : > { %1582 = vmatprep.subr.msk.bf16.mxu1 %vm1800_vm2, %v1580_v45  ;;  %1591 = vmatprep.subr.bf16.mxu0 %v1590_v27 }
 0x196   : > { %1593 = vmatpush3.bf16.msra.mxu0 %v1590_v27 }
 0x198   : > { %1585 = vmatpush3.bf16.xpose.msk.msra.mxu1 %vm1800_vm2, %v1580_v45  ;;  %v291_v45 = vld [vmem:[%s2005_s3 + $0x38] sm:$0xff] }
 0x19f   : > { %1491 = vmatmul.mubr.msk.f32.vlgmr.msra.gmra.mrb[0].mxu1 %vm400_vm1, %v422_v39 }
 0x1a0   : > { %1493 = vmatprep.mubr.msk.f32.mxu1 %vm400_vm1, %v423_v43  ;;  %v290_v43 = vld [vmem:[%s2005_s3 + $0x30] sm:$0xff] }
 0x1a3   : > { %1494 = vmatmul.mubr.msk.f32.gmra.mrb[2].mxu1 %vm400_vm1, %v424_v44  ;;  %v1594_v44 = vpack.c.bf16 %v289_v42, %v288_v41 }
 0x1a5   : > { %1603 = vmatprep.subr.bf16.mxu1 %v1594_v44  ;;  %1595 = vmatprep.subr.bf16.mxu0 %v1594_v44 }
 0x1a6   : > { %1605 = vmatpush3.bf16.msra.mxu1 %v1594_v44 }
 0x272   : > { %v1492_v46 = vpop.f32.mrb[0].mxu1 }
 0x273   : > { %v523_v47 = vmul.f32 30.0, %v1492_v46  ;;  %v503_v48 = vpop.f32.mrb[1].mxu1  ;;  %v276_v46 = vld [vmem:[%s258_s22] sm:$0xff] }
 0x274   : > { %v522_v49 = vmul.f32 30.0, %v503_v48  ;;  %1532 = vmatprep.mubr.msk.f32.mxu1 %vm298_vm0, %v276_v46  ;;  %v277_v48 = vld [vmem:[%s258_s22 + $0x8] sm:$0xff] }
 0x275   : > { %v529_v50 = vsel %vm298_vm0, %v523_v47, -inf }
 0x276   : > { %530 = vmax.xlane.f32.xlu1 %v529_v50  ;;  %v1495_v51 = vpop.f32.mrb[2].mxu1  ;;  %v526_v52 = vsel %vm298_vm0, %v522_v49, -inf  ;;  %v279_v50 = vld [vmem:[%s258_s22 + $0x18] sm:$0xff] }
 0x277   : > { %v525_v53 = vmul.f32 30.0, %v1495_v51  ;;  %527 = vmax.xlane.f32.xlu0 %v526_v52  ;;  %v513_v54 = vpop.f32.mrb[3].mxu1 }
 0x278   : > { %v524_v55 = vmul.f32 30.0, %v513_v54 }
 0x279   : > { %v535_v56 = vsel %vm298_vm0, %v525_v53, -inf }
 0x27a   : > { %536 = vmax.xlane.f32.xlu1 %v535_v56  ;;  %v532_v57 = vsel %vm298_vm0, %v524_v55, -inf }
 0x27b   : > { %533 = vmax.xlane.f32.xlu0 %v532_v57 }
 0x303   : > { %v531_v58 = vpop.xlane.xlu1 %530 }
 0x304   : > { %v539_v59 = vsub.f32 %v523_v47, %v531_v58  ;;  %v528_v60 = vpop.xlane.xlu0 %527  ;;  %v1598_v47 = vpack.c.bf16 %v291_v45, %v290_v43 }
 0x305   : > { %v538_v61 = vsub.f32 %v522_v49, %v528_v60  ;;  %v278_v49 = vld [vmem:[%s258_s22 + $0x10] sm:$0xff] }
 0x306   : > { %v544_v62 = vmul.f32 1.442695, %v539_v59  ;;  %1607 = vmatprep.subr.bf16.mxu1 %v1598_v47 }
 0x307   : > { %v542_v63 = vmul.f32 1.442695, %v538_v61  ;;  %v537_v0 = vpop.xlane.xlu1 %536  ;;  %1609 = vmatpush3.bf16.msra.mxu1 %v1598_v47 }
 0x308   : > { %1654 = vpow2.f32 %v544_v62  ;;  %v541_v1 = vsub.f32 %v525_v53, %v537_v0  ;;  %v534_v2 = vpop.xlane.xlu0 %533 }
 0x309   : > { %1656 = vpow2.f32 %v542_v63  ;;  %v540_v3 = vsub.f32 %v524_v55, %v534_v2 }
 0x30a   : > { %v548_v4 = vmul.f32 1.442695, %v541_v1  ;;  %1533 = vmatmul.mubr.msk.f32.vlgmr.msra.gmra.mrb[4].mxu1 %vm298_vm0, %v277_v48 }
 0x30b   : > { %v546_v5 = vmul.f32 1.442695, %v540_v3  ;;  %1535 = vmatprep.mubr.msk.f32.mxu1 %vm298_vm0, %v278_v49 }
 0x30c   : > { %1658 = vpow2.f32 %v548_v4 }
 0x30d   : > { %1660 = vpow2.f32 %v546_v5 }
 0x30e   : > { %1536 = vmatmul.mubr.msk.f32.gmra.mrb[6].mxu1 %vm298_vm0, %v279_v50 }
 0x312   : > { %v1655_v10 = vpop.eup %1654 }
 0x313   : > { %v1657_v11 = vpop.eup %1656  ;;  %v553_v12 = vsel %vm298_vm0, %v1655_v10, 0.0 }
 0x314   : > { %554 = vadd.xlane.f32.xlu1 %v553_v12  ;;  %v550_v13 = vsel %vm298_vm0, %v1657_v11, 0.0 }
 0x315   : > { %551 = vadd.xlane.f32.xlu0 %v550_v13 }
 0x316   : > { %v1659_v14 = vpop.eup %1658 }
 0x317   : > { %v1661_v15 = vpop.eup %1660  ;;  %v559_v16 = vsel %vm298_vm0, %v1659_v14, 0.0 }
 0x318   : > { %560 = vadd.xlane.f32.xlu1 %v559_v16  ;;  %v556_v17 = vsel %vm298_vm0, %v1661_v15, 0.0 }
 0x319   : > { %557 = vadd.xlane.f32.xlu0 %v556_v17 }
 0x3a1   : > { %v555_v28 = vpop.xlane.xlu1 %554 }
 0x3a2   : > { %1662 = vrcp.f32 %v555_v28  ;;  %v552_v29 = vpop.xlane.xlu0 %551 }
 0x3a3   : > { %1664 = vrcp.f32 %v552_v29 }
 0x3a5   : > { %v561_v30 = vpop.xlane.xlu1 %560 }
 0x3a6   : > { %1666 = vrcp.f32 %v561_v30  ;;  %v558_v31 = vpop.xlane.xlu0 %557 }
 0x3a7   : > { %1668 = vrcp.f32 %v558_v31 }
 0x3ac   : > { %v1663_v32 = vpop.eup %1662 }
 0x3ad   : > { %v1665_v33 = vpop.eup %1664  ;;  %v567_v35 = vmul.f32 %v1663_v32, %v1655_v10 }
 0x3ae   : > { %v566_v34 = vmul.f32 %v1665_v33, %v1657_v11 }
 0x3b0   : > { %v1667_v36 = vpop.eup %1666  ;;  %1504 = vmatprep.mubr.msk.f32.mxu0 %vm298_vm0, %v566_v34 }
 0x3b1   : > { %v1669_v37 = vpop.eup %1668  ;;  %1505 = vmatmul.mubr.msk.f32.vlgmr.msra.gmra.mrb[4].mxu0 %vm298_vm0, %v567_v35  ;;  %v569_v39 = vmul.f32 %v1667_v36, %v1659_v14 }
 0x3b2   : > { %v568_v38 = vmul.f32 %v1669_v37, %v1661_v15  ;;  %1597 = vmatpush3.bf16.msra.mxu0 %v1594_v44 }
 0x3b3   : > { %1599 = vmatprep.subr.bf16.mxu0 %v1598_v47 }
 0x3b4   : > { %1507 = vmatprep.mubr.msk.f32.mxu0 %vm298_vm0, %v568_v38 }
 0x3b5   : > { %1508 = vmatmul.mubr.msk.f32.gmra.mrb[6].mxu0 %vm298_vm0, %v569_v39 }
 0x3b6   : > { %1601 = vmatpush3.bf16.msra.mxu0 %v1598_v47 }
 0x484   : > { %v1506_v51 = vpop.f32.mrb[4].mxu0 }
 0x485   : > { %v1868_v52 = vadd.f32 %v1506_v51, %v1778_v7  ;;  %v652_v53 = vpop.f32.mrb[5].mxu0 }
 0x486   : > { %v1871_v54 = vadd.f32 %v652_v53, %v1774_v6 }
 0x487   : > { %v676_v55 = vmul.f32 %v1868_v52, %v1868_v52 }
 0x488   : > { %v675_v56 = vmul.f32 %v1871_v54, %v1871_v54  ;;  %v1509_v57 = vpop.f32.mrb[6].mxu0 }
 0x489   : > { %v1878_v58 = vadd.f32 %v1509_v57, %v1786_v9  ;;  %v662_v59 = vpop.f32.mrb[7].mxu0  ;;  %v678_v60 = vsel %vm298_vm0, %v676_v55, 0.0  ;;  %v1890_v9 = vld [vmem:[%s2006_s4 + $0x1] ss:$0 sm:$0xff] }
 0x48a   : > { %v673_v7 = vadd.f32 %v662_v59, %v1780_v8  ;;  %v677_v61 = vsel %vm298_vm0, %v675_v56, 0.0  ;;  %v1534_v8 = vpop.f32.mrb[4].mxu1 }
 0x48b   : > { %v697_v6 = vmul.f32 %v1878_v58, %v1878_v58  ;;  %v679_v62 = vadd.f32 %v678_v60, %v677_v61  ;;  %v1893_v3 = vadd.f32 %v1534_v8, %v1890_v9  ;;  %v928_v4 = vpop.f32.mrb[5].mxu1 }
 0x48c   : > { %v696_v63 = vmul.f32 %v673_v7, %v673_v7  ;;  %v1896_v5 = vadd.f32 %v1890_v9, %v928_v4  ;;  %v1537_v10 = vpop.f32.mrb[6].mxu1 }
 0x48d   : > { %680 = vadd.xlane.f32.xlu0 %v679_v62  ;;  %v699_v0 = vsel %vm298_vm0, %v697_v6, 0.0  ;;  %v948_v11 = vmul.f32 %v1893_v3, %v1893_v3  ;;  %v1901_v12 = vadd.f32 %v1537_v10, %v1890_v9  ;;  %v938_v13 = vpop.f32.mrb[7].mxu1 }
 0x48e   : > { %v698_v1 = vsel %vm298_vm0, %v696_v63, 0.0  ;;  %v947_v14 = vmul.f32 %v1896_v5, %v1896_v5  ;;  %v1906_v15 = vadd.f32 %v1890_v9, %v938_v13 }
 0x48f   : > { %v700_v2 = vadd.f32 %v699_v0, %v698_v1  ;;  %v954_v16 = vsel %vm400_vm1, %v948_v11, 0.0  ;;  %v950_v17 = vmul.f32 %v1901_v12, %v1901_v12 }
 0x490   : > { %v951_v20 = vsel %vm400_vm1, %v947_v14, 0.0  ;;  %v949_v21 = vmul.f32 %v1906_v15, %v1906_v15 }
 0x491   : > { %701 = vadd.xlane.f32.xlu1 %v700_v2  ;;  %952 = vadd.xlane.f32.xlu0 %v951_v20  ;;  %v960_v24 = vsel %vm400_vm1, %v950_v17, 0.0 }
 0x492   : > { %v957_v25 = vsel %vm400_vm1, %v949_v21, 0.0 }
 0x495   : > { %955 = vadd.xlane.f32.xlu1 %v954_v16  ;;  %958 = vadd.xlane.f32.xlu0 %v957_v25 }
 0x499   : > { %961 = vadd.xlane.f32.xlu1 %v960_v24 }
 0x51a   : > { %v681_v26 = vpop.xlane.xlu0 %680 }
 0x51b   : > { %v682_v27 = vrot.slane %v681_v26, 4 }
 0x51d   : > { %v683_v28 = vadd.f32 %v682_v27, %v681_v26 }
 0x51e   : > { %v702_v29 = vpop.xlane.xlu1 %701 }
 0x51f   : > { %v684_v30 = vrot.slane %v683_v28, 2  ;;  %v703_v31 = vrot.slane %v702_v29, 4 }
 0x521   : > { %v704_v32 = vadd.f32 %v703_v31, %v702_v29  ;;  %v685_v33 = vadd.f32 %v684_v30, %v683_v28 }
 0x522   : > { %v956_v59 = vpop.xlane.xlu1 %955 }
 0x523   : > { %v705_v34 = vrot.slane %v704_v32, 2  ;;  %v686_v35 = vrot.slane %v685_v33, 1  ;;  %v964_v60 = vmax.f32 %v956_v59, 1e-24 }
 0x525   : > { %v687_v36 = vadd.f32 %v686_v35, %v685_v33  ;;  %v706_v37 = vadd.f32 %v705_v34, %v704_v32 }
 0x526   : > { %v962_v6 = vpop.xlane.xlu1 %961 }
 0x527   : > { %1630 = vpush %v687_v36  ;;  %v707_v38 = vrot.slane %v706_v37, 1  ;;  %v966_v62 = vmax.f32 %v962_v6, 1e-24 }
 0x529   : > { %v708_v39 = vadd.f32 %v707_v38, %v706_v37 }
 0x52b   : > { %1632 = vpush %v708_v39 }
 0x558   : > { %s1631_s27 = spop %1630 }
 0x559   : > { %v689_v41 = vstv %s1631_s27 }
 0x55a   : > { %v690_v42 = vadd.f32 1e-05, %v689_v41 }
 0x55c   : > { %1670 = vrsqrt.f32 %v690_v42  ;;  %s1633_s28 = spop %1632 }
 0x55d   : > { %v710_v43 = vstv %s1633_s28 }
 0x55e   : > { %v711_v44 = vadd.f32 1e-05, %v710_v43 }
 0x560   : > { %1672 = vrsqrt.f32 %v711_v44 }
 0x561   : > { %1674 = vrsqrt.f32 %v964_v60 }
 0x566   : > { %v1671_v45 = vpop.eup %1670 }
 0x567   : > { %v692_v46 = vmul.f32 %v1671_v45, %v1871_v54  ;;  %v693_v47 = vmul.f32 %v1671_v45, %v1868_v52 }
 0x569   : > { %694 = vst.msk [vmem:[#allocation2] sm:$0xff] %vm298_vm0, %v692_v46  ;;  %695 = vst.msk [vmem:[#allocation2 + $0x8] sm:$0xff] %vm298_vm0, %v693_v47 }
 0x56a   : > { %v1673_v48 = vpop.eup %1672 }
 0x56b   : > { %v713_v49 = vmul.f32 %v1673_v48, %v673_v7  ;;  %v714_v50 = vmul.f32 %v1673_v48, %v1878_v58  ;;  %v953_v7 = vpop.xlane.xlu0 %952 }
 0x56c   : > { %v963_v61 = vmax.f32 %v953_v7, 1e-24 }
 0x56d   : > { %715 = vst.msk [vmem:[#allocation2 + $0x10] sm:$0xff] %vm298_vm0, %v713_v49  ;;  %716 = vst.msk [vmem:[#allocation2 + $0x18] sm:$0xff] %vm298_vm0, %v714_v50 }
 0x56e   : > { %1676 = vrsqrt.f32 %v963_v61 }
 0x56f   : > { %1678 = vrsqrt.f32 %v966_v62 }
 0x570   : > { %v1923_v51 = vld [vmem:[#allocation2] sm:$0xff]  ;;  %v1925_v53 = vld [vmem:[#allocation2 + $0x8] sm:$0xff] }
 0x571   : > { %1518 = vmatprep.mubr.msk.f32.mxu0 %vm298_vm0, %v1923_v51  ;;  %v1132_v52 = vadd.f32 %v1923_v51, %v1827_v18  ;;  %v1133_v54 = vadd.f32 %v1925_v53, %v1829_v19 }
 0x572   : > { %1519 = vmatmul.mubr.msk.f32.vlgmr.msra.gmra.mrb[8].mxu0 %vm298_vm0, %v1925_v53 }
 0x573   : > { %v1622_v55 = vpack.c.bf16 %v1133_v54, %v1132_v52 }
 0x574   : > { %v1935_v56 = vld [vmem:[#allocation2 + $0x10] sm:$0xff]  ;;  %v1937_v57 = vld [vmem:[#allocation2 + $0x18] sm:$0xff] }
 0x575   : > { %1521 = vmatprep.mubr.msk.f32.mxu0 %vm298_vm0, %v1935_v56  ;;  %v1134_v58 = vadd.f32 %v1935_v56, %v1835_v22  ;;  %1623 = vmatprep.subr.bf16.mxu1 %v1622_v55  ;;  %v1135_v18 = vadd.f32 %v1937_v57, %v1837_v23  ;;  %v959_v22 = vpop.xlane.xlu0 %958  ;;  %v1675_v23 = vpop.eup %1674 }
 0x576   : > { %1522 = vmatmul.mubr.msk.f32.gmra.mrb[10].mxu0 %vm298_vm0, %v1937_v57  ;;  %1625 = vmatpush3.bf16.msra.mxu1 %v1622_v55  ;;  %v965_v63 = vmax.f32 %v959_v22, 1e-24  ;;  %v972_v1 = vmul.f32 %v1675_v23, %v1893_v3 }
 0x577   : > { %v1626_v19 = vpack.c.bf16 %v1135_v18, %v1134_v58 }
 0x578   : > { %1680 = vrsqrt.f32 %v965_v63  ;;  %v1677_v0 = vpop.eup %1676 }
 0x579   : > { %1627 = vmatprep.subr.bf16.mxu1 %v1626_v19  ;;  %v971_v2 = vmul.f32 %v1677_v0, %v1896_v5  ;;  %v1679_v8 = vpop.eup %1678 }
 0x57a   : > { %1629 = vmatpush3.bf16.msra.mxu1 %v1626_v19  ;;  %v974_v11 = vmul.f32 %v1679_v8, %v1901_v12 }
 0x57b   : > { %v1610_v4 = vpack.c.bf16 %v972_v1, %v971_v2 }
 0x57d   : > { %1612 = vmatprep.subr.msk.bf16.mxu0 %vm1800_vm2, %v1610_v4 }
 0x57e   : > { %1615 = vmatpush3.bf16.xpose.msk.msra.mxu0 %vm1800_vm2, %v1610_v4 }
 0x582   : > { %v1681_v10 = vpop.eup %1680 }
 0x583   : > { %v973_v13 = vmul.f32 %v1681_v10, %v1906_v15 }
 0x585   : > { %v1616_v14 = vpack.c.bf16 %v974_v11, %v973_v13 }
 0x587   : > { %1618 = vmatprep.subr.msk.bf16.mxu0 %vm1800_vm2, %v1616_v14 }
 0x588   : > { %1621 = vmatpush3.bf16.xpose.msk.msra.mxu0 %vm1800_vm2, %v1616_v14 }
 0x645   : > { %v1520_v3 = vpop.f32.mrb[8].mxu0 }
 0x646   : > { %v809_v5 = vadd.f32 %v1520_v3, %v1890_v9  ;;  %v803_v16 = vpop.f32.mrb[9].mxu0 }
 0x647   : > { %v804_v12 = vadd.f32 %v1890_v9, %v803_v16 }
 0x648   : > { %v823_v17 = vmul.f32 %v809_v5, %v809_v5 }
 0x649   : > { %v1523_v20 = vpop.f32.mrb[10].mxu0  ;;  %v822_v21 = vmul.f32 %v804_v12, %v804_v12 }
 0x64a   : > { %v819_v15 = vadd.f32 %v1523_v20, %v1890_v9  ;;  %v813_v24 = vpop.f32.mrb[11].mxu0  ;;  %v829_v25 = vsel %vm400_vm1, %v823_v17, 0.0 }
 0x64b   : > { %v814_v26 = vadd.f32 %v1890_v9, %v813_v24  ;;  %830 = vadd.xlane.f32.xlu1 %v829_v25  ;;  %v826_v40 = vsel %vm400_vm1, %v822_v21, 0.0 }
 0x64c   : > { %827 = vadd.xlane.f32.xlu0 %v826_v40  ;;  %v825_v27 = vmul.f32 %v819_v15, %v819_v15 }
 0x64d   : > { %v824_v28 = vmul.f32 %v814_v26, %v814_v26 }
 0x64e   : > { %v835_v29 = vsel %vm400_vm1, %v825_v27, 0.0 }
 0x64f   : > { %836 = vadd.xlane.f32.xlu1 %v835_v29  ;;  %v832_v30 = vsel %vm400_vm1, %v824_v28, 0.0 }
 0x650   : > { %833 = vadd.xlane.f32.xlu0 %v832_v30 }
 0x6d8   : > { %v831_v31 = vpop.xlane.xlu1 %830 }
 0x6d9   : > { %v839_v32 = vmax.f32 %v831_v31, 1e-24  ;;  %v828_v33 = vpop.xlane.xlu0 %827 }
 0x6da   : > { %v838_v34 = vmax.f32 %v828_v33, 1e-24 }
 0x6db   : > { %1682 = vrsqrt.f32 %v839_v32 }
 0x6dc   : > { %1684 = vrsqrt.f32 %v838_v34  ;;  %v837_v35 = vpop.xlane.xlu1 %836 }
 0x6dd   : > { %v841_v9 = vmax.f32 %v837_v35, 1e-24  ;;  %v834_v36 = vpop.xlane.xlu0 %833 }
 0x6de   : > { %v840_v37 = vmax.f32 %v834_v36, 1e-24 }
 0x6df   : > { %1686 = vrsqrt.f32 %v841_v9 }
 0x6e0   : > { %1688 = vrsqrt.f32 %v840_v37 }
 0x6e5   : > { %v1683_v38 = vpop.eup %1682 }
 0x6e6   : > { %v1685_v39 = vpop.eup %1684  ;;  %v847_v42 = vmul.f32 %v1683_v38, %v809_v5 }
 0x6e7   : > { %v846_v41 = vmul.f32 %v1685_v39, %v804_v12 }
 0x6e9   : > { %v1687_v43 = vpop.eup %1686  ;;  %1546 = vmatprep.mubr.msk.f32.mxu0 %vm400_vm1, %v846_v41 }
 0x6ea   : > { %v1689_v44 = vpop.eup %1688  ;;  %1547 = vmatmul.mubr.msk.f32.vlgmr.msra.gmra.mrb[12].mxu0 %vm400_vm1, %v847_v42  ;;  %v849_v46 = vmul.f32 %v1687_v43, %v819_v15 }
 0x6eb   : > { %v848_v45 = vmul.f32 %v1689_v44, %v814_v26 }
 0x6ed   : > { %1549 = vmatprep.mubr.msk.f32.mxu0 %vm400_vm1, %v848_v45 }
 0x6ee   : > { %1550 = vmatmul.mubr.msk.f32.gmra.mrb[14].mxu0 %vm400_vm1, %v849_v46 }
 0x7bd   : > { %v1548_v47 = vpop.f32.mrb[12].mxu0 }
 0x7be   : > { %v1085_v48 = vmul.f32 30.0, %v1548_v47  ;;  %v1065_v49 = vpop.f32.mrb[13].mxu0 }
 0x7bf   : > { %v1084_v50 = vmul.f32 30.0, %v1065_v49 }
 0x7c0   : > { %v1091_v52 = vsel %vm298_vm0, %v1085_v48, -inf }
 0x7c1   : > { %1092 = vmax.xlane.f32.xlu1 %v1091_v52  ;;  %v1551_v54 = vpop.f32.mrb[14].mxu0  ;;  %v1088_v55 = vsel %vm298_vm0, %v1084_v50, -inf }
 0x7c2   : > { %v1087_v58 = vmul.f32 30.0, %v1551_v54  ;;  %1089 = vmax.xlane.f32.xlu0 %v1088_v55  ;;  %v1075_v18 = vpop.f32.mrb[15].mxu0 }
 0x7c3   : > { %v1086_v19 = vmul.f32 30.0, %v1075_v18 }
 0x7c4   : > { %v1097_v59 = vsel %vm298_vm0, %v1087_v58, -inf }
 0x7c5   : > { %1098 = vmax.xlane.f32.xlu1 %v1097_v59  ;;  %v1094_v60 = vsel %vm298_vm0, %v1086_v19, -inf }
 0x7c6   : > { %1095 = vmax.xlane.f32.xlu0 %v1094_v60 }
 0x84e   : > { %v1093_v7 = vpop.xlane.xlu1 %1092 }
 0x84f   : > { %v1101_v61 = vsub.f32 %v1085_v48, %v1093_v7  ;;  %v1090_v6 = vpop.xlane.xlu0 %1089 }
 0x850   : > { %v1100_v62 = vsub.f32 %v1084_v50, %v1090_v6 }
 0x851   : > { %v1106_v22 = vmul.f32 1.442695, %v1101_v61 }
 0x852   : > { %v1104_v63 = vmul.f32 1.442695, %v1100_v62  ;;  %v1099_v23 = vpop.xlane.xlu1 %1098 }
 0x853   : > { %1690 = vpow2.f32 %v1106_v22  ;;  %v1103_v0 = vsub.f32 %v1087_v58, %v1099_v23  ;;  %v1096_v1 = vpop.xlane.xlu0 %1095 }
 0x854   : > { %1692 = vpow2.f32 %v1104_v63  ;;  %v1102_v2 = vsub.f32 %v1086_v19, %v1096_v1 }
 0x855   : > { %v1110_v8 = vmul.f32 1.442695, %v1103_v0 }
 0x856   : > { %v1108_v4 = vmul.f32 1.442695, %v1102_v2 }
 0x857   : > { %1694 = vpow2.f32 %v1110_v8 }
 0x858   : > { %1696 = vpow2.f32 %v1108_v4 }
 0x85d   : > { %v1691_v10 = vpop.eup %1690 }
 0x85e   : > { %v1693_v11 = vpop.eup %1692  ;;  %v1115_v13 = vsel %vm298_vm0, %v1691_v10, 0.0 }
 0x85f   : > { %1116 = vadd.xlane.f32.xlu1 %v1115_v13  ;;  %v1112_v14 = vsel %vm298_vm0, %v1693_v11, 0.0 }
 0x860   : > { %1113 = vadd.xlane.f32.xlu0 %v1112_v14 }
 0x861   : > { %v1695_v3 = vpop.eup %1694 }
 0x862   : > { %v1697_v5 = vpop.eup %1696  ;;  %v1121_v16 = vsel %vm298_vm0, %v1695_v3, 0.0 }
 0x863   : > { %1122 = vadd.xlane.f32.xlu1 %v1121_v16  ;;  %v1118_v12 = vsel %vm298_vm0, %v1697_v5, 0.0 }
 0x864   : > { %1119 = vadd.xlane.f32.xlu0 %v1118_v12 }
 0x8ec   : > { %v1117_v17 = vpop.xlane.xlu1 %1116 }
 0x8ed   : > { %1698 = vrcp.f32 %v1117_v17  ;;  %v1114_v20 = vpop.xlane.xlu0 %1113 }
 0x8ee   : > { %1700 = vrcp.f32 %v1114_v20 }
 0x8f0   : > { %v1123_v21 = vpop.xlane.xlu1 %1122 }
 0x8f1   : > { %1702 = vrcp.f32 %v1123_v21  ;;  %v1120_v15 = vpop.xlane.xlu0 %1119 }
 0x8f2   : > { %1704 = vrcp.f32 %v1120_v15 }
 0x8f7   : > { %v1699_v24 = vpop.eup %1698 }
 0x8f8   : > { %v1701_v25 = vpop.eup %1700  ;;  %v1129_v40 = vmul.f32 %v1699_v24, %v1691_v10 }
 0x8f9   : > { %v1128_v26 = vmul.f32 %v1701_v25, %v1693_v11 }
 0x8fb   : > { %v1703_v27 = vpop.eup %1702  ;;  %1560 = vmatprep.mubr.msk.f32.mxu1 %vm298_vm0, %v1128_v26 }
 0x8fc   : > { %v1705_v28 = vpop.eup %1704  ;;  %1561 = vmatmul.mubr.msk.f32.vlgmr.msra.gmra.mrb[8].mxu1 %vm298_vm0, %v1129_v40  ;;  %v1131_v30 = vmul.f32 %v1703_v27, %v1695_v3 }
 0x8fd   : > { %v1130_v29 = vmul.f32 %v1705_v28, %v1697_v5 }
 0x8ff   : > { %1563 = vmatprep.mubr.msk.f32.mxu1 %vm298_vm0, %v1130_v29 }
 0x900   : > { %1564 = vmatmul.mubr.msk.f32.gmra.mrb[10].mxu1 %vm298_vm0, %v1131_v30 }
 0x9cf   : > { %v1562_v31 = vpop.f32.mrb[8].mxu1 }
 0x9d0   : > { %v1234_v32 = vadd.f32 %v1562_v31, %v1925_v53  ;;  %v1214_v33 = vpop.f32.mrb[9].mxu1 }
 0x9d1   : > { %v1233_v34 = vadd.f32 %v1214_v33, %v1923_v51 }
 0x9d2   : > { %v1238_v35 = vmul.f32 %v1234_v32, %v1234_v32 }
 0x9d3   : > { %v1237_v9 = vmul.f32 %v1233_v34, %v1233_v34  ;;  %v1565_v36 = vpop.f32.mrb[10].mxu1 }
 0x9d4   : > { %v1236_v37 = vadd.f32 %v1565_v36, %v1937_v57  ;;  %v1224_v38 = vpop.f32.mrb[11].mxu1  ;;  %v1240_v39 = vsel %vm298_vm0, %v1238_v35, 0.0 }
 0x9d5   : > { %v1235_v41 = vadd.f32 %v1224_v38, %v1935_v56  ;;  %v1239_v42 = vsel %vm298_vm0, %v1237_v9, 0.0 }
 0x9d6   : > { %v1259_v43 = vmul.f32 %v1236_v37, %v1236_v37  ;;  %v1241_v44 = vadd.f32 %v1240_v39, %v1239_v42 }
 0x9d7   : > { %v1258_v45 = vmul.f32 %v1235_v41, %v1235_v41 }
 0x9d8   : > { %1242 = vadd.xlane.f32.xlu0 %v1241_v44  ;;  %v1261_v53 = vsel %vm298_vm0, %v1259_v43, 0.0 }
 0x9d9   : > { %v1260_v51 = vsel %vm298_vm0, %v1258_v45, 0.0 }
 0x9da   : > { %v1262_v46 = vadd.f32 %v1261_v53, %v1260_v51 }
 0x9dc   : > { %1263 = vadd.xlane.f32.xlu1 %v1262_v46 }
 0xa65   : > { %v1243_v47 = vpop.xlane.xlu0 %1242 }
 0xa66   : > { %v1244_v48 = vrot.slane %v1243_v47, 4 }
 0xa68   : > { %v1245_v57 = vadd.f32 %v1244_v48, %v1243_v47 }
 0xa69   : > { %v1264_v49 = vpop.xlane.xlu1 %1263 }
 0xa6a   : > { %v1246_v50 = vrot.slane %v1245_v57, 2  ;;  %v1265_v52 = vrot.slane %v1264_v49, 4 }
 0xa6c   : > { %v1247_v54 = vadd.f32 %v1246_v50, %v1245_v57  ;;  %v1266_v56 = vadd.f32 %v1265_v52, %v1264_v49 }
 0xa6e   : > { %v1267_v55 = vrot.slane %v1266_v56, 2  ;;  %v1248_v58 = vrot.slane %v1247_v54, 1 }
 0xa70   : > { %v1268_v18 = vadd.f32 %v1267_v55, %v1266_v56  ;;  %v1249_v19 = vadd.f32 %v1248_v58, %v1247_v54 }
 0xa72   : > { %1634 = vpush %v1249_v19  ;;  %v1269_v59 = vrot.slane %v1268_v18, 1 }
 0xa74   : > { %v1270_v60 = vadd.f32 %v1269_v59, %v1268_v18 }
 0xa76   : > { %1636 = vpush %v1270_v60 }
 0xaa3   : > { %s1635_s30 = spop %1634 }
 0xaa4   : > { %v1251_v7 = vstv %s1635_s30 }
 0xaa5   : > { %v1252_v61 = vadd.f32 1e-05, %v1251_v7 }
 0xaa7   : > { %1706 = vrsqrt.f32 %v1252_v61  ;;  %s1637_s6 = spop %1636 }
 0xaa8   : > { %v1272_v6 = vstv %s1637_s6 }
 0xaa9   : > { %v1273_v62 = vadd.f32 1e-05, %v1272_v6 }
 0xaab   : > { %1708 = vrsqrt.f32 %v1273_v62 }
 0xab1   : > { %v1707_v22 = vpop.eup %1706 }
 0xab2   : > { %v1254_v63 = vmul.f32 %v1707_v22, %v1233_v34  ;;  %v1255_v23 = vmul.f32 %v1707_v22, %v1234_v32 }
 0xab4   : > { %1256 = vst.msk [vmem:[%s270_s9] sm:$0xff] %vm298_vm0, %v1254_v63  ;;  %1257 = vst.msk [vmem:[%s270_s9 + $0x8] sm:$0xff] %vm298_vm0, %v1255_v23 }
 0xab5   : > { %v1709_v0 = vpop.eup %1708 }
 0xab6   : > { %v1275_v1 = vmul.f32 %v1709_v0, %v1235_v41  ;;  %v1276_v2 = vmul.f32 %v1709_v0, %v1236_v37 }
 0xab8   : > { %1277 = vst.msk [vmem:[%s270_s9 + $0x10] sm:$0xff] %vm298_vm0, %v1275_v1  ;;  %1278 = vst.msk [vmem:[%s270_s9 + $0x18] sm:$0xff] %vm298_vm0, %v1276_v2 }
 0xab9 PF: > { %s15_s18 = sadd.s32 1, %s1716_s18  }
 0xaba   : > { %p12_p4 = scmp.ge.s32.totalorder %s15_s18, 4  }
 0xabc   :  { %14 = sbr.rel (!%p12_p4) target bundleno = 1 (0x1), region = 76 }

</bundles_post_ra>
